<compile_context>
chip_gen: v5e
topology: v5e:2x2
jax: 0.10.0
libtpu: 0.0.40
codegen_flags: <defaults>
</compile_context>

<pallas_src>
import jax
import jax.numpy as jnp
from jax.experimental import pallas as pl
from jax.experimental.pallas import tpu as pltpu


def _linear_kernel(x_ref, w_ref, b_ref, o_ref):
    # x_ref: (B, K) bf16, w_ref: (K, N) bf16, b_ref: (1, N) f32, o_ref: (B, N) f32
    # Standard contraction: contracting dim K is the RHS sublane axis, so the
    # MXU consumes the weight directly with no relayout.
    acc = jnp.dot(x_ref[...], w_ref[...], preferred_element_type=jnp.float32)
    o_ref[...] = (acc + b_ref[...]).astype(o_ref.dtype)


def _linear_net_forward_impl(x_nchw, w_kn, bias):
    """Forward pass: y = x.view(B, -1) @ W.T + b.

    w_kn is the nn.Linear weight already transposed to [K, N] (done once at
    parameter-setup time, off the hot path) and stored in bfloat16.
    """
    B = x_nchw.shape[0]
    K, N = w_kn.shape

    # Flatten exactly like x.view(x.shape[0], -1) (row-major over C, H, W),
    # then cast to bf16 for native MXU input (fuses with the reshape under jit).
    x_flat = x_nchw.reshape(B, K).astype(jnp.bfloat16)
    b_2d = bias.reshape(1, N).astype(jnp.float32)

    cost = pl.CostEstimate(
        flops=2 * B * K * N,
        transcendentals=0,
        bytes_accessed=(B * K + K * N) * 2 + (N + B * N) * 4,
    )

    out = pl.pallas_call(
        _linear_kernel,
        out_shape=jax.ShapeDtypeStruct((B, N), jnp.float32),
        # Gridless: full arrays, resident in VMEM for the single invocation.
        in_specs=[
            pl.BlockSpec(memory_space=pltpu.MemorySpace.VMEM),  # x_flat [B, K]
            pl.BlockSpec(memory_space=pltpu.MemorySpace.VMEM),  # w_kn   [K, N]
            pl.BlockSpec(memory_space=pltpu.MemorySpace.VMEM),  # bias   [1, N]
        ],
        out_specs=pl.BlockSpec(memory_space=pltpu.MemorySpace.VMEM),
        cost_estimate=cost,
    )(x_flat, w_kn, b_2d)

    return out


# jit so the reshape / dtype cast fuse with the producers and don't become
# separate dispatches around the custom call.
linear_net_forward = jax.jit(_linear_net_forward_impl)


def prepare_linear_params(weight_nk, bias_n):
    """One-time parameter setup (NOT per forward call): pre-transpose the
    nn.Linear weight [N, K] -> [K, N] and store it in bfloat16."""
    w_kn = jnp.asarray(weight_nk).T.astype(jnp.bfloat16)
    b = jnp.asarray(bias_n).astype(jnp.float32)
    return w_kn, b


if __name__ == "__main__":
    # Small shapes consistent with the module: B=2, C=4, H=W=16 -> K=1024, N=32
    B, C, H, W = 2, 4, 16, 16
    K = C * H * W
    N = 32

    key = jax.random.PRNGKey(0)
    kx, kw, kb = jax.random.split(key, 3)

    x = jax.random.normal(kx, (B, C, H, W), dtype=jnp.float32)

    # Deterministic parameter init mimicking nn.Linear's uniform(-1/sqrt(K), 1/sqrt(K))
    bound = 1.0 / jnp.sqrt(jnp.float32(K))
    weight = jax.random.uniform(kw, (N, K), dtype=jnp.float32,
                                minval=-bound, maxval=bound)
    bias = jax.random.uniform(kb, (N,), dtype=jnp.float32,
                              minval=-bound, maxval=bound)

    # One-time parameter prep (off the hot path).
    w_kn, b_f32 = prepare_linear_params(weight, bias)

    y = linear_net_forward(x, w_kn, b_f32)
    y = jax.block_until_ready(y)
    assert y.shape == (B, N)

    # Tight check against a bf16-consistent reference (same operand rounding,
    # f32 accumulate) — verifies the kernel math exactly.
    x_bf = x.reshape(B, -1).astype(jnp.bfloat16).astype(jnp.float32)
    w_bf = weight.astype(jnp.bfloat16).astype(jnp.float32)
    y_ref_bf16 = x_bf @ w_bf.T + bias
    assert jnp.allclose(y, y_ref_bf16, atol=1e-3, rtol=1e-3)

    # Looser sanity check against the pure-f32 module semantics
    # (y = x.view(B,-1) @ W.T + b); difference is only bf16 input rounding.
    y_ref_f32 = x.reshape(B, -1) @ weight.T + bias
    assert jnp.allclose(y, y_ref_f32, atol=5e-2, rtol=5e-2)

    print("KERNEL_OK")
</pallas_src>

<mosaic_0001>
module attributes {stable_mosaic.version = 11 : i64} {
  func.func @_linear_kernel(%arg0: memref<2x1024xbf16, #tpu.memory_space<vmem>>, %arg1: memref<1024x32xbf16, #tpu.memory_space<vmem>>, %arg2: memref<1x32xf32, #tpu.memory_space<vmem>>, %arg3: memref<2x32xf32, #tpu.memory_space<vmem>>) attributes {dimension_semantics = [], scalar_prefetch = 0 : i64, scratch_operands = 0 : i64, tpu.core_type = #tpu.core_type<tc>} {
    %c0 = arith.constant 0 : index
    %c0_0 = arith.constant 0 : index
    %0 = vector.load %arg0[%c0, %c0_0] : memref<2x1024xbf16, #tpu.memory_space<vmem>>, vector<2x1024xbf16>
    %c0_1 = arith.constant 0 : index
    %c0_2 = arith.constant 0 : index
    %1 = vector.load %arg1[%c0_1, %c0_2] : memref<1024x32xbf16, #tpu.memory_space<vmem>>, vector<1024x32xbf16>
    %cst = arith.constant dense<0.000000e+00> : vector<2x32xf32>
    %2 = tpu.matmul %0, %1, %cst {dimension_numbers = #tpu.dot_dimension_numbers<[1], [0], [0], [1], [0, 0, 1, 1], [], []>} : vector<2x1024xbf16>, vector<1024x32xbf16>, vector<2x32xf32> -> vector<2x32xf32>
    %c0_3 = arith.constant 0 : index
    %c0_4 = arith.constant 0 : index
    %3 = vector.load %arg2[%c0_3, %c0_4] : memref<1x32xf32, #tpu.memory_space<vmem>>, vector<1x32xf32>
    %4 = vector.broadcast %3 : vector<1x32xf32> to vector<2x32xf32>
    %5 = arith.addf %2, %4 : vector<2x32xf32>
    %c0_5 = arith.constant 0 : index
    %c0_6 = arith.constant 0 : index
    %6 = vector.load %arg3[%c0_5, %c0_6] : memref<2x32xf32, #tpu.memory_space<vmem>>, vector<2x32xf32>
    tpu.vector_store %arg3[%c0_5, %c0_6], %5 {strides = array<i32>} : memref<2x32xf32, #tpu.memory_space<vmem>>, vector<2x32xf32>,
    return
  }
}

</mosaic_0001>

<bundles_post_ra>
// kernel: _linear_net_forward_impl.1
= control target key start
LH: loop header
LB: loop body
LE: loop exit
PB: predicated region body
PF: predicated region fallthrough
CT: control target
= control target key end

     0   :  { %s1242_s0 = inlined_call_operand.vmem [shape: bf16[2,1024], index: 0, kind: input, shape index: {}]   ;;  %s1243_s1 = inlined_call_operand.vmem [shape: bf16[1024,32], index: 1, kind: input, shape index: {}]   ;;  %s1244_s2 = inlined_call_operand.vmem [shape: f32[1,32], index: 2, kind: input, shape index: {}]   ;;  %s1245_s3 = inlined_call_operand.hbm [shape: f32[2,32], index: 3, kind: output, shape index: {}]  }
   0x1   :  { %v935_v0 = vld [vmem:[%s1243_s1 + $0x38] sm:$0xff]  ;;  %v934_v4 = vld [vmem:[%s1243_s1 + $0x30] sm:$0xff]  ;;  %v933_v8 = vld [vmem:[%s1243_s1 + $0x28] sm:$0xff] }
   0x2   :  { %v943_v1 = vld [vmem:[%s1243_s1 + $0x78] sm:$0xff]  ;;  %550 = vmatpush.bf16.msra.mxu0 %v935_v0  ;;  %v942_v5 = vld [vmem:[%s1243_s1 + $0x70] sm:$0xff]  ;;  %v941_v9 = vld [vmem:[%s1243_s1 + $0x68] sm:$0xff] }
   0x3   :  { %v951_v2 = vld [vmem:[%s1243_s1 + $0xb8] sm:$0xff]  ;;  %563 = vmatpush.bf16.msra.mxu1 %v943_v1  ;;  %v950_v6 = vld [vmem:[%s1243_s1 + $0xb0] sm:$0xff]  ;;  %v949_v10 = vld [vmem:[%s1243_s1 + $0xa8] sm:$0xff] }
   0x4   :  { %v959_v3 = vld [vmem:[%s1243_s1 + $0xf8] sm:$0xff]  ;;  %576 = vmatpush.bf16.msra.mxu2 %v951_v2  ;;  %v958_v7 = vld [vmem:[%s1243_s1 + $0xf0] sm:$0xff]  ;;  %v957_v11 = vld [vmem:[%s1243_s1 + $0xe8] sm:$0xff] }
   0x5   :  { %589 = vmatpush.bf16.msra.mxu3 %v959_v3  ;;  %v932_v12 = vld [vmem:[%s1243_s1 + $0x20] sm:$0xff]  ;;  %v931_v17 = vld [vmem:[%s1243_s1 + $0x18] sm:$0xff]  ;;  %v930_v21 = vld [vmem:[%s1243_s1 + $0x10] sm:$0xff] }
   0x6   :  { %551 = vmatpush.bf16.msra.mxu0 %v934_v4  ;;  %v940_v13 = vld [vmem:[%s1243_s1 + $0x60] sm:$0xff]  ;;  %v939_v18 = vld [vmem:[%s1243_s1 + $0x58] sm:$0xff]  ;;  %v938_v22 = vld [vmem:[%s1243_s1 + $0x50] sm:$0xff] }
   0x7   :  { %564 = vmatpush.bf16.msra.mxu1 %v942_v5  ;;  %v948_v14 = vld [vmem:[%s1243_s1 + $0xa0] sm:$0xff]  ;;  %v947_v19 = vld [vmem:[%s1243_s1 + $0x98] sm:$0xff] }
   0x8   :  { %577 = vmatpush.bf16.msra.mxu2 %v950_v6  ;;  %v956_v15 = vld [vmem:[%s1243_s1 + $0xe0] sm:$0xff]  ;;  %v955_v20 = vld [vmem:[%s1243_s1 + $0xd8] sm:$0xff] }
   0x9   :  { %590 = vmatpush.bf16.msra.mxu3 %v958_v7  ;;  %v15_v16 = vld [vmem:[%s1242_s0] sm:$0xff] }
   0xa   :  { %552 = vmatpush.bf16.msra.mxu0 %v933_v8  ;;  %149 = vst [vmem:[#allocation1] ss:$9 sm:$0xff] %v15_v16 }
   0xb   :  { %565 = vmatpush.bf16.msra.mxu1 %v941_v9 }
   0xc   :  { %578 = vmatpush.bf16.msra.mxu2 %v949_v10 }
   0xd   :  { %591 = vmatpush.bf16.msra.mxu3 %v957_v11 }
   0xe   :  { %553 = vmatpush.bf16.msra.mxu0 %v932_v12 }
   0xf   :  { %566 = vmatpush.bf16.msra.mxu1 %v940_v13 }
  0x10   :  { %579 = vmatpush.bf16.msra.mxu2 %v948_v14 }
  0x11   :  { %592 = vmatpush.bf16.msra.mxu3 %v956_v15 }
  0x12   :  { %554 = vmatpush.bf16.msra.mxu0 %v931_v17 }
  0x13   :  { %567 = vmatpush.bf16.msra.mxu1 %v939_v18 }
  0x14   :  { %8 = vsyncpa [#allocation3], 0  ;;  %580 = vmatpush.bf16.msra.mxu2 %v947_v19  ;;  %v946_v23 = vld [vmem:[%s1243_s1 + $0x90] sm:$0xff]  ;;  %v929_v25 = vld [vmem:[%s1243_s1 + $0x8] sm:$0xff]  ;;  %s1020_s4 = smov [#allocation2]   ;;  %s663_s8 = sshll.u32 %s1245_s3, 4  ;;  %s664_s8 = int_to_ptr.hbm [resolvable:$true] %s663_s8 }
  0x15   :  { %593 = vmatpush.bf16.msra.mxu3 %v955_v20  ;;  %v954_v24 = vld [vmem:[%s1243_s1 + $0xd0] sm:$0xff]  ;;  %v937_v26 = vld [vmem:[%s1243_s1 + $0x48] sm:$0xff]  ;;  %v928_v29 = vld [vmem:[%s1243_s1] sm:$0xff]  ;;  %s661_s5 = sshll.u32 %s1020_s4, 4  ;;  %vm654_vm0 = vcmask 254976   ;;  %s662_s5 = int_to_ptr.vmem [resolvable:$true] %s661_s5 }
  0x16   :  { %555 = vmatpush.bf16.msra.mxu0 %v930_v21  ;;  %v945_v27 = vld [vmem:[%s1243_s1 + $0x88] sm:$0xff]  ;;  %v936_v30 = vld [vmem:[%s1243_s1 + $0x40] sm:$0xff]  ;;  %v967_v33 = vld [vmem:[%s1243_s1 + $0x138] sm:$0xff] }
  0x17   :  { %568 = vmatpush.bf16.msra.mxu1 %v938_v22  ;;  %v953_v28 = vld [vmem:[%s1243_s1 + $0xc8] sm:$0xff]  ;;  %v944_v31 = vld [vmem:[%s1243_s1 + $0x80] sm:$0xff]  ;;  %v975_v34 = vld [vmem:[%s1243_s1 + $0x178] sm:$0xff] }
  0x18   :  { %581 = vmatpush.bf16.msra.mxu2 %v946_v23  ;;  %v952_v32 = vld [vmem:[%s1243_s1 + $0xc0] sm:$0xff]  ;;  %v983_v35 = vld [vmem:[%s1243_s1 + $0x1b8] sm:$0xff]  ;;  %v966_v37 = vld [vmem:[%s1243_s1 + $0x130] sm:$0xff] }
  0x19   :  { %594 = vmatpush.bf16.msra.mxu3 %v954_v24  ;;  %v991_v36 = vld [vmem:[%s1243_s1 + $0x1f8] sm:$0xff]  ;;  %v974_v40 = vld [vmem:[%s1243_s1 + $0x170] sm:$0xff]  ;;  %v150_v41 = vld [vmem:[#allocation1] sm:$0xff] }
  0x1a   :  { %556 = vmatpush.bf16.msra.mxu0 %v929_v25  ;;  %v152_v38 = vld [vmem:[#allocation1 + $0x12] sm:$0xff]  ;;  %v153_v39 = vld [vmem:[#allocation1 + $0x1b] sm:$0xff]  ;;  %v151_v42 = vld [vmem:[#allocation1 + $0x9] sm:$0xff] }
  0x1b   :  { %569 = vmatpush.bf16.msra.mxu1 %v937_v26  ;;  %v982_v43 = vld [vmem:[%s1243_s1 + $0x1b0] sm:$0xff]  ;;  %v965_v45 = vld [vmem:[%s1243_s1 + $0x128] sm:$0xff]  ;;  %v964_v49 = vld [vmem:[%s1243_s1 + $0x120] sm:$0xff] }
  0x1c   :  { %582 = vmatpush.bf16.msra.mxu2 %v945_v27  ;;  %v990_v44 = vld [vmem:[%s1243_s1 + $0x1f0] sm:$0xff]  ;;  %v973_v46 = vld [vmem:[%s1243_s1 + $0x168] sm:$0xff]  ;;  %v972_v50 = vld [vmem:[%s1243_s1 + $0x160] sm:$0xff] }
  0x1d   :  { %595 = vmatpush.bf16.msra.mxu3 %v953_v28  ;;  %v981_v47 = vld [vmem:[%s1243_s1 + $0x1a8] sm:$0xff]  ;;  %v980_v51 = vld [vmem:[%s1243_s1 + $0x1a0] sm:$0xff]  ;;  %v963_v53 = vld [vmem:[%s1243_s1 + $0x118] sm:$0xff] }
  0x1e   :  { %557 = vmatpush.bf16.msra.mxu0 %v928_v29  ;;  %v989_v48 = vld [vmem:[%s1243_s1 + $0x1e8] sm:$0xff]  ;;  %v988_v52 = vld [vmem:[%s1243_s1 + $0x1e0] sm:$0xff]  ;;  %v971_v54 = vld [vmem:[%s1243_s1 + $0x158] sm:$0xff] }
  0x1f   :  { %570 = vmatpush.bf16.msra.mxu1 %v936_v30  ;;  %v979_v55 = vld [vmem:[%s1243_s1 + $0x198] sm:$0xff]  ;;  %v962_v57 = vld [vmem:[%s1243_s1 + $0x110] sm:$0xff]  ;;  %v961_v61 = vld [vmem:[%s1243_s1 + $0x108] sm:$0xff] }
  0x20   :  { %583 = vmatpush.bf16.msra.mxu2 %v944_v31  ;;  %v987_v56 = vld [vmem:[%s1243_s1 + $0x1d8] sm:$0xff]  ;;  %v970_v58 = vld [vmem:[%s1243_s1 + $0x150] sm:$0xff]  ;;  %v969_v62 = vld [vmem:[%s1243_s1 + $0x148] sm:$0xff] }
  0x21   :  { %596 = vmatpush.bf16.msra.mxu3 %v952_v32  ;;  %558 = vmatmul.bf16.vlgmr.msra.gmra.mxu0 %v150_v41  ;;  %v978_v59 = vld [vmem:[%s1243_s1 + $0x190] sm:$0xff]  ;;  %v977_v63 = vld [vmem:[%s1243_s1 + $0x188] sm:$0xff]  ;;  %v960_v1 = vld [vmem:[%s1243_s1 + $0x100] sm:$0xff] }
  0x22   :  { %602 = vmatpush.bf16.msrb.mxu0 %v967_v33  ;;  %571 = vmatmul.bf16.vlgmr.msra.gmra.mxu1 %v151_v42  ;;  %v986_v60 = vld [vmem:[%s1243_s1 + $0x1d0] sm:$0xff]  ;;  %v985_v0 = vld [vmem:[%s1243_s1 + $0x1c8] sm:$0xff]  ;;  %v968_v2 = vld [vmem:[%s1243_s1 + $0x140] sm:$0xff] }
  0x23   :  { %615 = vmatpush.bf16.msrb.mxu1 %v975_v34  ;;  %584 = vmatmul.bf16.vlgmr.msra.gmra.mxu2 %v152_v38  ;;  %v976_v3 = vld [vmem:[%s1243_s1 + $0x180] sm:$0xff]  ;;  %v155_v6 = vld [vmem:[#allocation1 + $0x2d] sm:$0xff]  ;;  %v156_v7 = vld [vmem:[#allocation1 + $0x36] sm:$0xff] }
  0x24   :  { %628 = vmatpush.bf16.msrb.mxu2 %v983_v35  ;;  %597 = vmatmul.bf16.vlgmr.msra.gmra.mxu3 %v153_v39  ;;  %v984_v4 = vld [vmem:[%s1243_s1 + $0x1c0] sm:$0xff] }
  0x25   :  { %641 = vmatpush.bf16.msrb.mxu3 %v991_v36  ;;  %v154_v5 = vld [vmem:[#allocation1 + $0x24] sm:$0xff]  ;;  %v993_v15 = vld [vmem:[%s1244_s2] ss:$0 sm:$0xff] }
  0x26   :  { %603 = vmatpush.bf16.msrb.mxu0 %v966_v37  ;;  %v157_v8 = vld [vmem:[#allocation1 + $0x3f] sm:$0xff] }
  0x27   :  { %616 = vmatpush.bf16.msrb.mxu1 %v974_v40 }
  0x28   :  { %629 = vmatpush.bf16.msrb.mxu2 %v982_v43 }
  0x29   :  { %642 = vmatpush.bf16.msrb.mxu3 %v990_v44 }
  0x2a   :  { %604 = vmatpush.bf16.msrb.mxu0 %v965_v45 }
  0x2b   :  { %617 = vmatpush.bf16.msrb.mxu1 %v973_v46 }
  0x2c   :  { %630 = vmatpush.bf16.msrb.mxu2 %v981_v47 }
  0x2d   :  { %643 = vmatpush.bf16.msrb.mxu3 %v989_v48 }
  0x2e   :  { %605 = vmatpush.bf16.msrb.mxu0 %v964_v49 }
  0x2f   :  { %618 = vmatpush.bf16.msrb.mxu1 %v972_v50 }
  0x30   :  { %631 = vmatpush.bf16.msrb.mxu2 %v980_v51 }
  0x31   :  { %644 = vmatpush.bf16.msrb.mxu3 %v988_v52 }
  0x32   :  { %606 = vmatpush.bf16.msrb.mxu0 %v963_v53 }
  0x33   :  { %619 = vmatpush.bf16.msrb.mxu1 %v971_v54 }
  0x34   :  { %632 = vmatpush.bf16.msrb.mxu2 %v979_v55 }
  0x35   :  { %645 = vmatpush.bf16.msrb.mxu3 %v987_v56 }
  0x36   :  { %607 = vmatpush.bf16.msrb.mxu0 %v962_v57 }
  0x37   :  { %620 = vmatpush.bf16.msrb.mxu1 %v970_v58 }
  0x38   :  { %633 = vmatpush.bf16.msrb.mxu2 %v978_v59 }
  0x39   :  { %646 = vmatpush.bf16.msrb.mxu3 %v986_v60 }
  0x3a   :  { %608 = vmatpush.bf16.msrb.mxu0 %v961_v61 }
  0x3b   :  { %621 = vmatpush.bf16.msrb.mxu1 %v969_v62 }
  0x3c   :  { %634 = vmatpush.bf16.msrb.mxu2 %v977_v63 }
  0x3d   :  { %647 = vmatpush.bf16.msrb.mxu3 %v985_v0 }
  0x3e   :  { %609 = vmatpush.bf16.msrb.mxu0 %v960_v1 }
  0x3f   :  { %622 = vmatpush.bf16.msrb.mxu1 %v968_v2 }
  0x40   :  { %635 = vmatpush.bf16.msrb.mxu2 %v976_v3 }
  0x41   :  { %648 = vmatpush.bf16.msrb.mxu3 %v984_v4  ;;  %610 = vmatmul.bf16.vlgmr.msrb.gmra.mxu0 %v154_v5 }
  0x42   :  { %623 = vmatmul.bf16.vlgmr.msrb.gmra.mxu1 %v155_v6 }
  0x43   :  { %636 = vmatmul.bf16.vlgmr.msrb.gmra.mxu2 %v156_v7 }
  0x44   :  { %649 = vmatmul.bf16.vlgmr.msrb.gmra.mxu3 %v157_v8 }
  0x9e   :  { %v559_v9 = vpop.f32.mrf.mxu0 }
  0x9f   :  { %v572_v10 = vpop.f32.mrf.mxu1  ;;  %v560_v18 = vadd.f32 %v993_v15, %v559_v9 }
  0xa1   :  { %v573_v19 = vadd.f32 %v572_v10, %v560_v18 }
  0xa6   :  { %v585_v11 = vpop.f32.mrf.mxu2  ;;  %v561_v13 = vpop.f32.mrf.mxu0 }
  0xa7   :  { %v598_v12 = vpop.f32.mrf.mxu3  ;;  %v574_v14 = vpop.f32.mrf.mxu1  ;;  %v586_v20 = vadd.f32 %v585_v11, %v573_v19 }
  0xa9   :  { %v599_v21 = vadd.f32 %v598_v12, %v586_v20 }
  0xae   :  { %v587_v16 = vpop.f32.mrf.mxu2 }
  0xaf   :  { %v600_v17 = vpop.f32.mrf.mxu3 }
  0xbe   :  { %v611_v22 = vpop.f32.mrf.mxu0 }
  0xbf   :  { %v624_v23 = vpop.f32.mrf.mxu1  ;;  %v612_v24 = vadd.f32 %v611_v22, %v599_v21 }
  0xc1   :  { %v625_v25 = vadd.f32 %v624_v23, %v612_v24 }
  0xc6   :  { %v637_v26 = vpop.f32.mrf.mxu2  ;;  %v613_v29 = vpop.f32.mrf.mxu0 }
  0xc7   :  { %v650_v27 = vpop.f32.mrf.mxu3  ;;  %v638_v28 = vadd.f32 %v637_v26, %v625_v25  ;;  %v626_v30 = vpop.f32.mrf.mxu1 }
  0xc9   :  { %v651_v31 = vadd.f32 %v650_v27, %v638_v28 }
  0xcb   :  { %655 = vst.msk [vmem:[#allocation2] sm:$0x3] %vm654_vm0, %v651_v31 }
  0xcc   :  { %666 = dma.vmem_to_hbm [thread:$0]  %s662_s5, 32, %s664_s8, [#allocation3]  }
  0xce   :  { %v639_v32 = vpop.f32.mrf.mxu2 }
  0xcf   :  { %v652_v33 = vpop.f32.mrf.mxu3 }
  0xd0   :  { %1018 = dma.done.wait [#allocation3], 32  }
  0xd1   :  { %1019 = vsyncadd [#allocation3], 4294967264 }
  0xd2   :  { %671 = vsyncpa [#allocation3], 1 }

</bundles_post_ra>
